<compile_context>
chip_gen: v7x
topology: tpu7x:2x2x1
jax: 0.10.0
libtpu: 0.0.40
codegen_flags: <defaults>
</compile_context>

<pallas_src>
import functools

import jax
import jax.numpy as jnp
from jax.experimental import pallas as pl
from jax.experimental.pallas import tpu as pltpu

NF = 64            # hidden width of encoder/decoder
LN_EPS = 1e-5      # torch.nn.LayerNorm default eps
SLOPE = 0.2        # LeakyReLU negative slope
LANES = 128        # TPU lane width; feature dims are zero-padded to this
MU_LANE = 64       # lane offset of mu (and of log_var at MU_LANE+dim_z) in the output slab


# ---------------------------------------------------------------------------
# Kernel
# ---------------------------------------------------------------------------
def pose_vae_kernel(x_ref, eps_ref, w_ref, v_ref, out_ref, *, pose_size, dim_z):
    # x_ref  : [TB, pose_size] f32
    # eps_ref: [TB, dim_z]     f32 reparameterization noise
    # w_ref  : [6, 128, 128]   packed (zero-padded) weights, f32 or bf16
    # v_ref  : [16, 128]       packed biases / LN gamma / LN beta, f32
    # out_ref: [TB, 128]       lanes [0,pose)=x_recon, [64,64+dz)=mu, [64+dz,64+2dz)=log_var
    x = x_ref[...]
    eps = eps_ref[...]
    tb = x.shape[0]
    wdt = w_ref.dtype                      # matmul operand dtype (f32 or bf16)

    def vrow(r):                           # [1,128] f32 row of the bias / LN slab
        return v_ref[r:r + 1, :]

    def mm(a, wi):                         # [TB,128] x [128,128] MXU matmul, f32 accumulate
        return jnp.dot(a.astype(wdt), w_ref[wi], preferred_element_type=jnp.float32)

    def layernorm(h, gi, bi):
        # One-pass mean / variance over the NF real features.  Padded lanes of h are
        # exactly zero (weight columns / biases beyond NF are zero in the slabs), so
        # summing all 128 lanes and dividing by NF is exact.
        inv_nf = 1.0 / NF
        m = jnp.sum(h, axis=-1, keepdims=True) * inv_nf
        ex2 = jnp.sum(h * h, axis=-1, keepdims=True) * inv_nf
        var = jnp.maximum(ex2 - m * m, 0.0)          # guard tiny negative (review note)
        return (h - m) * jax.lax.rsqrt(var + LN_EPS) * vrow(gi) + vrow(bi)

    def lrelu(h):
        return jnp.where(h > 0, h, SLOPE * h)

    # ---- encoder ----
    h = jnp.dot(x.astype(wdt), w_ref[0, :pose_size, :],
                preferred_element_type=jnp.float32) + vrow(0)
    h = lrelu(layernorm(h, 1, 2))
    h = mm(h, 1) + vrow(3)
    h = lrelu(layernorm(h, 4, 5))

    # ---- fused mu | log_var projection (roll-free layout) ----
    # p lanes: [0,dz)=log_var (copy, aligned with eps), [64,64+dz)=mu,
    #          [64+dz,64+2dz)=log_var, everything else exactly 0.
    p = mm(h, 2) + vrow(6)

    # ---- reparameterize: z = mu + eps * exp(log_var / 2) ----
    std = jnp.exp(p[:, :dim_z] * 0.5)      # zero-offset lane slice, f32 EUP exp
    estd = eps * std                       # [TB, dim_z]

    # ---- decoder ----
    # z @ dw1 = mu @ dw1  (rows [64,64+dz) of w[3]; all other rows are zero, so the
    # log_var copies in p contribute nothing)  +  (eps*std) @ dw1  (same row slice).
    d = (mm(p, 3)
         + jnp.dot(estd.astype(wdt), w_ref[3, MU_LANE:MU_LANE + dim_z, :],
                   preferred_element_type=jnp.float32)
         + vrow(7))
    d = lrelu(layernorm(d, 8, 9))
    d = mm(d, 4) + vrow(10)
    d = lrelu(layernorm(d, 11, 12))
    xr = mm(d, 5) + vrow(13)               # x_recon at lanes [0,pose), exactly 0 elsewhere

    # Single lane-dense, full-width store:
    #   lanes < 64  -> x_recon (drops the log_var copy living at lanes [0,dz) of p)
    #   lanes >= 64 -> mu | log_var | zeros (straight from p, already in output layout)
    lane = jax.lax.broadcasted_iota(jnp.int32, (tb, LANES), 1)
    out_ref[...] = jnp.where(lane < MU_LANE, xr, p).astype(out_ref.dtype)


# ---------------------------------------------------------------------------
# Parameter init (natural PyTorch shapes) and slab packing
# ---------------------------------------------------------------------------
def init_params(key, pose_size, dim_z_init):
    """Deterministic synthetic parameter init (shapes match the PyTorch module)."""
    nf = NF
    names_shapes = [
        # encoder
        ("ew1", (pose_size, nf)), ("eb1", (1, nf)), ("eg1", (1, nf)), ("ebt1", (1, nf)),
        ("ew2", (nf, nf)),        ("eb2", (1, nf)), ("eg2", (1, nf)), ("ebt2", (1, nf)),
        ("wmu", (nf, dim_z_init)), ("bmu", (1, dim_z_init)),
        ("wlv", (nf, dim_z_init)), ("blv", (1, dim_z_init)),
        # decoder
        ("dw1", (dim_z_init, nf)), ("db1", (1, nf)), ("dg1", (1, nf)), ("dbt1", (1, nf)),
        ("dw2", (nf, nf)),         ("db2", (1, nf)), ("dg2", (1, nf)), ("dbt2", (1, nf)),
        ("dw3", (nf, pose_size)),  ("db3", (1, pose_size)),
    ]
    params = {}
    keys = jax.random.split(key, len(names_shapes))
    for k, (name, shape) in zip(keys, names_shapes):
        if name.startswith(("eg", "dg")):          # LayerNorm weight -> ones
            params[name] = jnp.ones(shape, jnp.float32)
        elif name.startswith(("ebt", "dbt")):      # LayerNorm bias -> zeros
            params[name] = jnp.zeros(shape, jnp.float32)
        else:                                      # Linear weight/bias -> small random
            params[name] = 0.1 * jax.random.normal(k, shape, jnp.float32)
    return params


def pack_params(params, pose_size, dim_z, w_dtype=jnp.float32):
    """Pack all parameters into two lane-dense, zero-padded slabs (once, host side).

    Correctness of the kernel relies on every lane/row NOT explicitly set below being
    exactly zero (LayerNorm stats, decoder-1 row selection, output packing); the slabs
    start from jnp.zeros so this holds by construction.
    """
    if pose_size > 64 or dim_z > 32:
        raise ValueError("packed layout requires pose_size <= 64 and dim_z <= 32")
    nf = NF

    w = jnp.zeros((6, LANES, LANES), jnp.float32)
    w = w.at[0, :pose_size, :nf].set(params["ew1"])
    w = w.at[1, :nf, :nf].set(params["ew2"])
    # fused projection, laid out so the kernel needs no runtime rotations:
    w = w.at[2, :nf, :dim_z].set(params["wlv"])                              # log_var copy @ eps lanes
    w = w.at[2, :nf, MU_LANE:MU_LANE + dim_z].set(params["wmu"])             # mu @ output lanes
    w = w.at[2, :nf, MU_LANE + dim_z:MU_LANE + 2 * dim_z].set(params["wlv"])  # log_var @ output lanes
    # decoder layer 1: rows aligned with mu's lanes; all other rows stay zero
    w = w.at[3, MU_LANE:MU_LANE + dim_z, :nf].set(params["dw1"])
    w = w.at[4, :nf, :nf].set(params["dw2"])
    w = w.at[5, :nf, :pose_size].set(params["dw3"])

    v = jnp.zeros((16, LANES), jnp.float32)
    rows = [("eb1", nf), ("eg1", nf), ("ebt1", nf),
            ("eb2", nf), ("eg2", nf), ("ebt2", nf)]
    for r, (name, n) in enumerate(rows):
        v = v.at[r, :n].set(params[name][0])
    # fused projection bias in the same lane layout as w[2]
    v = v.at[6, :dim_z].set(params["blv"][0])
    v = v.at[6, MU_LANE:MU_LANE + dim_z].set(params["bmu"][0])
    v = v.at[6, MU_LANE + dim_z:MU_LANE + 2 * dim_z].set(params["blv"][0])
    rows = [("db1", nf), ("dg1", nf), ("dbt1", nf),
            ("db2", nf), ("dg2", nf), ("dbt2", nf), ("db3", pose_size)]
    for r, (name, n) in enumerate(rows, start=7):
        v = v.at[r, :n].set(params[name][0])

    return w.astype(w_dtype), v


# ---------------------------------------------------------------------------
# Wrapper
# ---------------------------------------------------------------------------
def _pick_row_tile(b):
    # Largest 8-aligned tile dividing b, capped at 2048 rows, preferring >=2 grid steps so
    # the "parallel" batch axis can shard across both TensorCores on v7x and pipeline.
    best = None
    for t in (2048, 1024, 512, 256, 128, 64, 32, 16, 8):
        if b % t == 0:
            if best is None:
                best = t
            if b // t >= 2:
                return t
    if best is not None:
        return best          # b itself is the only dividing 8-aligned tile (grid of 1)
    return b                 # full-extent block (b not a multiple of 8)


@jax.jit
def pose_vae_forward_packed(x, eps, w_slab, v_slab):
    """Returns the packed [B,128] output slab:
       lanes [0,pose)=x_recon, [64,64+dz)=mu, [64+dz,64+2dz)=log_var."""
    b, pose_size = x.shape
    dim_z = eps.shape[1]
    assert pose_size <= 64 and dim_z <= 32

    tb = _pick_row_tile(b)
    kernel = functools.partial(pose_vae_kernel, pose_size=pose_size, dim_z=dim_z)

    return pl.pallas_call(
        kernel,
        out_shape=jax.ShapeDtypeStruct((b, LANES), jnp.float32),
        grid=(pl.cdiv(b, tb),),
        in_specs=[
            pl.BlockSpec((tb, pose_size), lambda i: (i, 0)),            # x (natural shape)
            pl.BlockSpec((tb, dim_z), lambda i: (i, 0)),                # eps (natural shape)
            pl.BlockSpec((6, LANES, LANES), lambda i: (0, 0, 0)),       # weight slab (resident)
            pl.BlockSpec((16, LANES), lambda i: (0, 0)),                # bias / LN slab (resident)
        ],
        out_specs=pl.BlockSpec((tb, LANES), lambda i: (i, 0)),          # packed output slab
        compiler_params=pltpu.CompilerParams(
            dimension_semantics=("parallel",)),
    )(x, eps, w_slab, v_slab)


def pose_vae_forward(x, eps, w_slab, v_slab):
    """Module-semantics API: (x_recon, mu, log_var).  The packed slab is sliced once here,
    at the consumer, outside the jitted pallas graph (perf-review item)."""
    out = pose_vae_forward_packed(x, eps, w_slab, v_slab)
    pose_size = x.shape[1]
    dim_z = eps.shape[1]
    return (out[:, :pose_size],
            out[:, MU_LANE:MU_LANE + dim_z],
            out[:, MU_LANE + dim_z:MU_LANE + 2 * dim_z])


# ---------------------------------------------------------------------------
# Pure-JAX reference (mirrors the PyTorch module) for correctness checking
# ---------------------------------------------------------------------------
def pose_vae_reference(x, eps, params):
    hp = jax.lax.Precision.HIGHEST   # keep the reference in true f32 on TPU

    def lin(h, w, b):
        return jnp.dot(h, w, precision=hp) + b

    def ln(h, g, b):
        m = jnp.mean(h, axis=-1, keepdims=True)
        v = jnp.mean((h - m) ** 2, axis=-1, keepdims=True)
        return (h - m) / jnp.sqrt(v + LN_EPS) * g + b

    def lrelu(h):
        return jnp.where(h > 0, h, SLOPE * h)

    h = lrelu(ln(lin(x, params["ew1"], params["eb1"]), params["eg1"], params["ebt1"]))
    h = lrelu(ln(lin(h, params["ew2"], params["eb2"]), params["eg2"], params["ebt2"]))
    mu = lin(h, params["wmu"], params["bmu"])
    lv = lin(h, params["wlv"], params["blv"])
    z = mu + eps * jnp.exp(lv * 0.5)
    d = lrelu(ln(lin(z, params["dw1"], params["db1"]), params["dg1"], params["dbt1"]))
    d = lrelu(ln(lin(d, params["dw2"], params["db2"]), params["dg2"], params["dbt2"]))
    xr = lin(d, params["dw3"], params["db3"])
    return xr, mu, lv


if __name__ == "__main__":
    B = 8            # batch
    POSE_SIZE = 24   # pose vector size
    DIM_Z = 16       # latent dim

    key = jax.random.PRNGKey(0)
    k_x, k_eps, k_p = jax.random.split(key, 3)

    x = jax.random.normal(k_x, (B, POSE_SIZE), jnp.float32)
    # TODO(synk): the PyTorch module draws eps with torch.randn_like inside forward; here eps
    # is an explicit input so the kernel is deterministic and checkable (an in-kernel
    # alternative would be pltpu.prng_seed + pltpu.prng_random_bits).
    eps = jax.random.normal(k_eps, (B, DIM_Z), jnp.float32)
    params = init_params(k_p, POSE_SIZE, DIM_Z)

    xr_ref, mu_ref, lv_ref = pose_vae_reference(x, eps, params)

    # --- f32 weight slab: functional correctness check ---------------------------------
    # Tolerance 2e-2 leaves headroom for the MXU's bf16-pass decomposition of f32 matmuls
    # on some TPU generations; any packing/layout bug would produce O(1) errors.
    w32, v32 = pack_params(params, POSE_SIZE, DIM_Z, jnp.float32)
    x_recon, mu, log_var = pose_vae_forward(x, eps, w32, v32)
    jax.block_until_ready((x_recon, mu, log_var))
    assert jnp.allclose(x_recon, xr_ref, atol=2e-2, rtol=2e-2)
    assert jnp.allclose(mu, mu_ref, atol=2e-2, rtol=2e-2)
    assert jnp.allclose(log_var, lv_ref, atol=2e-2, rtol=2e-2)

    # --- bf16 weight slab (native MXU path on v6e/v7x): relaxed tolerance --------------
    wbf, _ = pack_params(params, POSE_SIZE, DIM_Z, jnp.bfloat16)
    x_recon_b, mu_b, log_var_b = pose_vae_forward(x, eps, wbf, v32)
    jax.block_until_ready((x_recon_b, mu_b, log_var_b))
    assert jnp.allclose(x_recon_b, xr_ref, atol=6e-2, rtol=6e-2)
    assert jnp.allclose(mu_b, mu_ref, atol=6e-2, rtol=6e-2)
    assert jnp.allclose(log_var_b, lv_ref, atol=6e-2, rtol=6e-2)

    print("KERNEL_OK")
</pallas_src>

<mosaic_0001>
module attributes {stable_mosaic.version = 11 : i64} {
  func.func @pose_vae_kernel(%arg0: i32, %arg1: memref<8x24xf32, #tpu.memory_space<vmem>>, %arg2: memref<8x16xf32, #tpu.memory_space<vmem>>, %arg3: memref<6x128x128xf32, #tpu.memory_space<vmem>>, %arg4: memref<16x128xf32, #tpu.memory_space<vmem>>, %arg5: memref<8x128xf32, #tpu.memory_space<vmem>>) attributes {dimension_semantics = [#tpu.dimension_semantics<parallel>], iteration_bounds = array<i64: 1>, scalar_prefetch = 0 : i64, scratch_operands = 0 : i64, tpu.core_type = #tpu.core_type<tc>, window_params = [{transform_indices = @transform_0, window_bounds = array<i64: 8, 24>}, {transform_indices = @transform_1, window_bounds = array<i64: 8, 16>}, {pipeline_mode = #tpu.pipeline_mode<synchronous>, transform_indices = @transform_2, window_bounds = array<i64: 6, 128, 128>}, {pipeline_mode = #tpu.pipeline_mode<synchronous>, transform_indices = @transform_3, window_bounds = array<i64: 16, 128>}, {transform_indices = @transform_4, window_bounds = array<i64: 8, 128>}]} {
    %c0 = arith.constant 0 : index
    %c0_0 = arith.constant 0 : index
    %0 = vector.load %arg1[%c0, %c0_0] : memref<8x24xf32, #tpu.memory_space<vmem>>, vector<8x24xf32>
    %c0_1 = arith.constant 0 : index
    %c0_2 = arith.constant 0 : index
    %1 = vector.load %arg2[%c0_1, %c0_2] : memref<8x16xf32, #tpu.memory_space<vmem>>, vector<8x16xf32>
    %c0_3 = arith.constant 0 : index
    %c0_4 = arith.constant 0 : index
    %c0_5 = arith.constant 0 : index
    %2 = vector.load %arg3[%c0_3, %c0_4, %c0_5] : memref<6x128x128xf32, #tpu.memory_space<vmem>>, vector<1x24x128xf32>
    %3 = vector.shape_cast %2 : vector<1x24x128xf32> to vector<24x128xf32>
    %cst = arith.constant dense<0.000000e+00> : vector<8x128xf32>
    %4 = tpu.matmul %0, %3, %cst {dimension_numbers = #tpu.dot_dimension_numbers<[1], [0], [0], [1], [0, 0, 1, 1], [], []>} : vector<8x24xf32>, vector<24x128xf32>, vector<8x128xf32> -> vector<8x128xf32>
    %c0_6 = arith.constant 0 : index
    %c0_7 = arith.constant 0 : index
    %5 = vector.load %arg4[%c0_6, %c0_7] : memref<16x128xf32, #tpu.memory_space<vmem>>, vector<1x128xf32>
    %6 = vector.broadcast %5 : vector<1x128xf32> to vector<8x128xf32>
    %7 = arith.addf %4, %6 : vector<8x128xf32>
    %cst_8 = arith.constant dense<0.000000e+00> : vector<8xf32>
    %8 = vector.multi_reduction <add>, %7, %cst_8 [1] : vector<8x128xf32> to vector<8xf32>
    %9 = vector.shape_cast %8 : vector<8xf32> to vector<8x1xf32>
    %cst_9 = arith.constant 1.562500e-02 : f32
    %10 = vector.broadcast %cst_9 : f32 to vector<8x1xf32>
    %11 = arith.mulf %9, %10 : vector<8x1xf32>
    %12 = arith.mulf %7, %7 : vector<8x128xf32>
    %cst_10 = arith.constant dense<0.000000e+00> : vector<8xf32>
    %13 = vector.multi_reduction <add>, %12, %cst_10 [1] : vector<8x128xf32> to vector<8xf32>
    %14 = vector.shape_cast %13 : vector<8xf32> to vector<8x1xf32>
    %cst_11 = arith.constant 1.562500e-02 : f32
    %15 = vector.broadcast %cst_11 : f32 to vector<8x1xf32>
    %16 = arith.mulf %14, %15 : vector<8x1xf32>
    %17 = arith.mulf %11, %11 : vector<8x1xf32>
    %18 = arith.subf %16, %17 : vector<8x1xf32>
    %cst_12 = arith.constant 0.000000e+00 : f32
    %19 = vector.broadcast %cst_12 : f32 to vector<8x1xf32>
    %20 = arith.maximumf %18, %19 : vector<8x1xf32>
    %21 = vector.broadcast %11 : vector<8x1xf32> to vector<8x128xf32>
    %22 = arith.subf %7, %21 : vector<8x128xf32>
    %cst_13 = arith.constant 9.99999974E-6 : f32
    %23 = vector.broadcast %cst_13 : f32 to vector<8x1xf32>
    %24 = arith.addf %20, %23 : vector<8x1xf32>
    %25 = math.rsqrt %24 : vector<8x1xf32>
    %26 = vector.broadcast %25 : vector<8x1xf32> to vector<8x128xf32>
    %27 = arith.mulf %22, %26 : vector<8x128xf32>
    %c1 = arith.constant 1 : index
    %c0_14 = arith.constant 0 : index
    %28 = vector.load %arg4[%c1, %c0_14] : memref<16x128xf32, #tpu.memory_space<vmem>>, vector<1x128xf32>
    %29 = vector.broadcast %28 : vector<1x128xf32> to vector<8x128xf32>
    %30 = arith.mulf %27, %29 : vector<8x128xf32>
    %c2 = arith.constant 2 : index
    %c0_15 = arith.constant 0 : index
    %31 = vector.load %arg4[%c2, %c0_15] : memref<16x128xf32, #tpu.memory_space<vmem>>, vector<1x128xf32>
    %32 = vector.broadcast %31 : vector<1x128xf32> to vector<8x128xf32>
    %33 = arith.addf %30, %32 : vector<8x128xf32>
    %cst_16 = arith.constant 0.000000e+00 : f32
    %34 = vector.broadcast %cst_16 : f32 to vector<8x128xf32>
    %35 = arith.cmpf ogt, %33, %34 : vector<8x128xf32>
    %cst_17 = arith.constant 2.000000e-01 : f32
    %36 = vector.broadcast %cst_17 : f32 to vector<8x128xf32>
    %37 = arith.mulf %36, %33 : vector<8x128xf32>
    %38 = arith.select %35, %33, %37 : vector<8x128xi1>, vector<8x128xf32>
    %c1_18 = arith.constant 1 : index
    %c0_19 = arith.constant 0 : index
    %c0_20 = arith.constant 0 : index
    %39 = vector.load %arg3[%c1_18, %c0_19, %c0_20] : memref<6x128x128xf32, #tpu.memory_space<vmem>>, vector<1x128x128xf32>
    %40 = vector.shape_cast %39 : vector<1x128x128xf32> to vector<128x128xf32>
    %cst_21 = arith.constant dense<0.000000e+00> : vector<8x128xf32>
    %41 = tpu.matmul %38, %40, %cst_21 {dimension_numbers = #tpu.dot_dimension_numbers<[1], [0], [0], [1], [0, 0, 1, 1], [], []>} : vector<8x128xf32>, vector<128x128xf32>, vector<8x128xf32> -> vector<8x128xf32>
    %c3 = arith.constant 3 : index
    %c0_22 = arith.constant 0 : index
    %42 = vector.load %arg4[%c3, %c0_22] : memref<16x128xf32, #tpu.memory_space<vmem>>, vector<1x128xf32>
    %43 = vector.broadcast %42 : vector<1x128xf32> to vector<8x128xf32>
    %44 = arith.addf %41, %43 : vector<8x128xf32>
    %cst_23 = arith.constant dense<0.000000e+00> : vector<8xf32>
    %45 = vector.multi_reduction <add>, %44, %cst_23 [1] : vector<8x128xf32> to vector<8xf32>
    %46 = vector.shape_cast %45 : vector<8xf32> to vector<8x1xf32>
    %cst_24 = arith.constant 1.562500e-02 : f32
    %47 = vector.broadcast %cst_24 : f32 to vector<8x1xf32>
    %48 = arith.mulf %46, %47 : vector<8x1xf32>
    %49 = arith.mulf %44, %44 : vector<8x128xf32>
    %cst_25 = arith.constant dense<0.000000e+00> : vector<8xf32>
    %50 = vector.multi_reduction <add>, %49, %cst_25 [1] : vector<8x128xf32> to vector<8xf32>
    %51 = vector.shape_cast %50 : vector<8xf32> to vector<8x1xf32>
    %cst_26 = arith.constant 1.562500e-02 : f32
    %52 = vector.broadcast %cst_26 : f32 to vector<8x1xf32>
    %53 = arith.mulf %51, %52 : vector<8x1xf32>
    %54 = arith.mulf %48, %48 : vector<8x1xf32>
    %55 = arith.subf %53, %54 : vector<8x1xf32>
    %cst_27 = arith.constant 0.000000e+00 : f32
    %56 = vector.broadcast %cst_27 : f32 to vector<8x1xf32>
    %57 = arith.maximumf %55, %56 : vector<8x1xf32>
    %58 = vector.broadcast %48 : vector<8x1xf32> to vector<8x128xf32>
    %59 = arith.subf %44, %58 : vector<8x128xf32>
    %cst_28 = arith.constant 9.99999974E-6 : f32
    %60 = vector.broadcast %cst_28 : f32 to vector<8x1xf32>
    %61 = arith.addf %57, %60 : vector<8x1xf32>
    %62 = math.rsqrt %61 : vector<8x1xf32>
    %63 = vector.broadcast %62 : vector<8x1xf32> to vector<8x128xf32>
    %64 = arith.mulf %59, %63 : vector<8x128xf32>
    %c4 = arith.constant 4 : index
    %c0_29 = arith.constant 0 : index
    %65 = vector.load %arg4[%c4, %c0_29] : memref<16x128xf32, #tpu.memory_space<vmem>>, vector<1x128xf32>
    %66 = vector.broadcast %65 : vector<1x128xf32> to vector<8x128xf32>
    %67 = arith.mulf %64, %66 : vector<8x128xf32>
    %c5 = arith.constant 5 : index
    %c0_30 = arith.constant 0 : index
    %68 = vector.load %arg4[%c5, %c0_30] : memref<16x128xf32, #tpu.memory_space<vmem>>, vector<1x128xf32>
    %69 = vector.broadcast %68 : vector<1x128xf32> to vector<8x128xf32>
    %70 = arith.addf %67, %69 : vector<8x128xf32>
    %cst_31 = arith.constant 0.000000e+00 : f32
    %71 = vector.broadcast %cst_31 : f32 to vector<8x128xf32>
    %72 = arith.cmpf ogt, %70, %71 : vector<8x128xf32>
    %cst_32 = arith.constant 2.000000e-01 : f32
    %73 = vector.broadcast %cst_32 : f32 to vector<8x128xf32>
    %74 = arith.mulf %73, %70 : vector<8x128xf32>
    %75 = arith.select %72, %70, %74 : vector<8x128xi1>, vector<8x128xf32>
    %c2_33 = arith.constant 2 : index
    %c0_34 = arith.constant 0 : index
    %c0_35 = arith.constant 0 : index
    %76 = vector.load %arg3[%c2_33, %c0_34, %c0_35] : memref<6x128x128xf32, #tpu.memory_space<vmem>>, vector<1x128x128xf32>
    %77 = vector.shape_cast %76 : vector<1x128x128xf32> to vector<128x128xf32>
    %cst_36 = arith.constant dense<0.000000e+00> : vector<8x128xf32>
    %78 = tpu.matmul %75, %77, %cst_36 {dimension_numbers = #tpu.dot_dimension_numbers<[1], [0], [0], [1], [0, 0, 1, 1], [], []>} : vector<8x128xf32>, vector<128x128xf32>, vector<8x128xf32> -> vector<8x128xf32>
    %c6 = arith.constant 6 : index
    %c0_37 = arith.constant 0 : index
    %79 = vector.load %arg4[%c6, %c0_37] : memref<16x128xf32, #tpu.memory_space<vmem>>, vector<1x128xf32>
    %80 = vector.broadcast %79 : vector<1x128xf32> to vector<8x128xf32>
    %81 = arith.addf %78, %80 : vector<8x128xf32>
    %82 = vector.extract_strided_slice %81 {offsets = [0, 0], sizes = [8, 16], strides = [1, 1]} : vector<8x128xf32> to vector<8x16xf32>
    %cst_38 = arith.constant 5.000000e-01 : f32
    %83 = vector.broadcast %cst_38 : f32 to vector<8x16xf32>
    %84 = arith.mulf %82, %83 : vector<8x16xf32>
    %85 = math.exp %84 : vector<8x16xf32>
    %86 = arith.mulf %1, %85 : vector<8x16xf32>
    %c3_39 = arith.constant 3 : index
    %c0_40 = arith.constant 0 : index
    %c0_41 = arith.constant 0 : index
    %87 = vector.load %arg3[%c3_39, %c0_40, %c0_41] : memref<6x128x128xf32, #tpu.memory_space<vmem>>, vector<1x128x128xf32>
    %88 = vector.shape_cast %87 : vector<1x128x128xf32> to vector<128x128xf32>
    %cst_42 = arith.constant dense<0.000000e+00> : vector<8x128xf32>
    %89 = tpu.matmul %81, %88, %cst_42 {dimension_numbers = #tpu.dot_dimension_numbers<[1], [0], [0], [1], [0, 0, 1, 1], [], []>} : vector<8x128xf32>, vector<128x128xf32>, vector<8x128xf32> -> vector<8x128xf32>
    %c3_43 = arith.constant 3 : index
    %c64 = arith.constant 64 : index
    %c0_44 = arith.constant 0 : index
    %90 = vector.load %arg3[%c3_43, %c64, %c0_44] : memref<6x128x128xf32, #tpu.memory_space<vmem>>, vector<1x16x128xf32>
    %91 = vector.shape_cast %90 : vector<1x16x128xf32> to vector<16x128xf32>
    %cst_45 = arith.constant dense<0.000000e+00> : vector<8x128xf32>
    %92 = tpu.matmul %86, %91, %cst_45 {dimension_numbers = #tpu.dot_dimension_numbers<[1], [0], [0], [1], [0, 0, 1, 1], [], []>} : vector<8x16xf32>, vector<16x128xf32>, vector<8x128xf32> -> vector<8x128xf32>
    %93 = arith.addf %89, %92 : vector<8x128xf32>
    %c7 = arith.constant 7 : index
    %c0_46 = arith.constant 0 : index
    %94 = vector.load %arg4[%c7, %c0_46] : memref<16x128xf32, #tpu.memory_space<vmem>>, vector<1x128xf32>
    %95 = vector.broadcast %94 : vector<1x128xf32> to vector<8x128xf32>
    %96 = arith.addf %93, %95 : vector<8x128xf32>
    %cst_47 = arith.constant dense<0.000000e+00> : vector<8xf32>
    %97 = vector.multi_reduction <add>, %96, %cst_47 [1] : vector<8x128xf32> to vector<8xf32>
    %98 = vector.shape_cast %97 : vector<8xf32> to vector<8x1xf32>
    %cst_48 = arith.constant 1.562500e-02 : f32
    %99 = vector.broadcast %cst_48 : f32 to vector<8x1xf32>
    %100 = arith.mulf %98, %99 : vector<8x1xf32>
    %101 = arith.mulf %96, %96 : vector<8x128xf32>
    %cst_49 = arith.constant dense<0.000000e+00> : vector<8xf32>
    %102 = vector.multi_reduction <add>, %101, %cst_49 [1] : vector<8x128xf32> to vector<8xf32>
    %103 = vector.shape_cast %102 : vector<8xf32> to vector<8x1xf32>
    %cst_50 = arith.constant 1.562500e-02 : f32
    %104 = vector.broadcast %cst_50 : f32 to vector<8x1xf32>
    %105 = arith.mulf %103, %104 : vector<8x1xf32>
    %106 = arith.mulf %100, %100 : vector<8x1xf32>
    %107 = arith.subf %105, %106 : vector<8x1xf32>
    %cst_51 = arith.constant 0.000000e+00 : f32
    %108 = vector.broadcast %cst_51 : f32 to vector<8x1xf32>
    %109 = arith.maximumf %107, %108 : vector<8x1xf32>
    %110 = vector.broadcast %100 : vector<8x1xf32> to vector<8x128xf32>
    %111 = arith.subf %96, %110 : vector<8x128xf32>
    %cst_52 = arith.constant 9.99999974E-6 : f32
    %112 = vector.broadcast %cst_52 : f32 to vector<8x1xf32>
    %113 = arith.addf %109, %112 : vector<8x1xf32>
    %114 = math.rsqrt %113 : vector<8x1xf32>
    %115 = vector.broadcast %114 : vector<8x1xf32> to vector<8x128xf32>
    %116 = arith.mulf %111, %115 : vector<8x128xf32>
    %c8 = arith.constant 8 : index
    %c0_53 = arith.constant 0 : index
    %117 = vector.load %arg4[%c8, %c0_53] : memref<16x128xf32, #tpu.memory_space<vmem>>, vector<1x128xf32>
    %118 = vector.broadcast %117 : vector<1x128xf32> to vector<8x128xf32>
    %119 = arith.mulf %116, %118 : vector<8x128xf32>
    %c9 = arith.constant 9 : index
    %c0_54 = arith.constant 0 : index
    %120 = vector.load %arg4[%c9, %c0_54] : memref<16x128xf32, #tpu.memory_space<vmem>>, vector<1x128xf32>
    %121 = vector.broadcast %120 : vector<1x128xf32> to vector<8x128xf32>
    %122 = arith.addf %119, %121 : vector<8x128xf32>
    %cst_55 = arith.constant 0.000000e+00 : f32
    %123 = vector.broadcast %cst_55 : f32 to vector<8x128xf32>
    %124 = arith.cmpf ogt, %122, %123 : vector<8x128xf32>
    %cst_56 = arith.constant 2.000000e-01 : f32
    %125 = vector.broadcast %cst_56 : f32 to vector<8x128xf32>
    %126 = arith.mulf %125, %122 : vector<8x128xf32>
    %127 = arith.select %124, %122, %126 : vector<8x128xi1>, vector<8x128xf32>
    %c4_57 = arith.constant 4 : index
    %c0_58 = arith.constant 0 : index
    %c0_59 = arith.constant 0 : index
    %128 = vector.load %arg3[%c4_57, %c0_58, %c0_59] : memref<6x128x128xf32, #tpu.memory_space<vmem>>, vector<1x128x128xf32>
    %129 = vector.shape_cast %128 : vector<1x128x128xf32> to vector<128x128xf32>
    %cst_60 = arith.constant dense<0.000000e+00> : vector<8x128xf32>
    %130 = tpu.matmul %127, %129, %cst_60 {dimension_numbers = #tpu.dot_dimension_numbers<[1], [0], [0], [1], [0, 0, 1, 1], [], []>} : vector<8x128xf32>, vector<128x128xf32>, vector<8x128xf32> -> vector<8x128xf32>
    %c10 = arith.constant 10 : index
    %c0_61 = arith.constant 0 : index
    %131 = vector.load %arg4[%c10, %c0_61] : memref<16x128xf32, #tpu.memory_space<vmem>>, vector<1x128xf32>
    %132 = vector.broadcast %131 : vector<1x128xf32> to vector<8x128xf32>
    %133 = arith.addf %130, %132 : vector<8x128xf32>
    %cst_62 = arith.constant dense<0.000000e+00> : vector<8xf32>
    %134 = vector.multi_reduction <add>, %133, %cst_62 [1] : vector<8x128xf32> to vector<8xf32>
    %135 = vector.shape_cast %134 : vector<8xf32> to vector<8x1xf32>
    %cst_63 = arith.constant 1.562500e-02 : f32
    %136 = vector.broadcast %cst_63 : f32 to vector<8x1xf32>
    %137 = arith.mulf %135, %136 : vector<8x1xf32>
    %138 = arith.mulf %133, %133 : vector<8x128xf32>
    %cst_64 = arith.constant dense<0.000000e+00> : vector<8xf32>
    %139 = vector.multi_reduction <add>, %138, %cst_64 [1] : vector<8x128xf32> to vector<8xf32>
    %140 = vector.shape_cast %139 : vector<8xf32> to vector<8x1xf32>
    %cst_65 = arith.constant 1.562500e-02 : f32
    %141 = vector.broadcast %cst_65 : f32 to vector<8x1xf32>
    %142 = arith.mulf %140, %141 : vector<8x1xf32>
    %143 = arith.mulf %137, %137 : vector<8x1xf32>
    %144 = arith.subf %142, %143 : vector<8x1xf32>
    %cst_66 = arith.constant 0.000000e+00 : f32
    %145 = vector.broadcast %cst_66 : f32 to vector<8x1xf32>
    %146 = arith.maximumf %144, %145 : vector<8x1xf32>
    %147 = vector.broadcast %137 : vector<8x1xf32> to vector<8x128xf32>
    %148 = arith.subf %133, %147 : vector<8x128xf32>
    %cst_67 = arith.constant 9.99999974E-6 : f32
    %149 = vector.broadcast %cst_67 : f32 to vector<8x1xf32>
    %150 = arith.addf %146, %149 : vector<8x1xf32>
    %151 = math.rsqrt %150 : vector<8x1xf32>
    %152 = vector.broadcast %151 : vector<8x1xf32> to vector<8x128xf32>
    %153 = arith.mulf %148, %152 : vector<8x128xf32>
    %c11 = arith.constant 11 : index
    %c0_68 = arith.constant 0 : index
    %154 = vector.load %arg4[%c11, %c0_68] : memref<16x128xf32, #tpu.memory_space<vmem>>, vector<1x128xf32>
    %155 = vector.broadcast %154 : vector<1x128xf32> to vector<8x128xf32>
    %156 = arith.mulf %153, %155 : vector<8x128xf32>
    %c12 = arith.constant 12 : index
    %c0_69 = arith.constant 0 : index
    %157 = vector.load %arg4[%c12, %c0_69] : memref<16x128xf32, #tpu.memory_space<vmem>>, vector<1x128xf32>
    %158 = vector.broadcast %157 : vector<1x128xf32> to vector<8x128xf32>
    %159 = arith.addf %156, %158 : vector<8x128xf32>
    %cst_70 = arith.constant 0.000000e+00 : f32
    %160 = vector.broadcast %cst_70 : f32 to vector<8x128xf32>
    %161 = arith.cmpf ogt, %159, %160 : vector<8x128xf32>
    %cst_71 = arith.constant 2.000000e-01 : f32
    %162 = vector.broadcast %cst_71 : f32 to vector<8x128xf32>
    %163 = arith.mulf %162, %159 : vector<8x128xf32>
    %164 = arith.select %161, %159, %163 : vector<8x128xi1>, vector<8x128xf32>
    %c5_72 = arith.constant 5 : index
    %c0_73 = arith.constant 0 : index
    %c0_74 = arith.constant 0 : index
    %165 = vector.load %arg3[%c5_72, %c0_73, %c0_74] : memref<6x128x128xf32, #tpu.memory_space<vmem>>, vector<1x128x128xf32>
    %166 = vector.shape_cast %165 : vector<1x128x128xf32> to vector<128x128xf32>
    %cst_75 = arith.constant dense<0.000000e+00> : vector<8x128xf32>
    %167 = tpu.matmul %164, %166, %cst_75 {dimension_numbers = #tpu.dot_dimension_numbers<[1], [0], [0], [1], [0, 0, 1, 1], [], []>} : vector<8x128xf32>, vector<128x128xf32>, vector<8x128xf32> -> vector<8x128xf32>
    %c13 = arith.constant 13 : index
    %c0_76 = arith.constant 0 : index
    %168 = vector.load %arg4[%c13, %c0_76] : memref<16x128xf32, #tpu.memory_space<vmem>>, vector<1x128xf32>
    %169 = vector.broadcast %168 : vector<1x128xf32> to vector<8x128xf32>
    %170 = arith.addf %167, %169 : vector<8x128xf32>
    %171 = tpu.iota {dimensions = array<i32: 1>} : vector<8x128xi32>
    %c64_i32 = arith.constant 64 : i32
    %172 = vector.broadcast %c64_i32 : i32 to vector<8x128xi32>
    %173 = arith.cmpi slt, %171, %172 : vector<8x128xi32>
    %174 = arith.select %173, %170, %81 : vector<8x128xi1>, vector<8x128xf32>
    %c0_77 = arith.constant 0 : index
    %c0_78 = arith.constant 0 : index
    %175 = vector.load %arg5[%c0_77, %c0_78] : memref<8x128xf32, #tpu.memory_space<vmem>>, vector<8x128xf32>
    tpu.vector_store %arg5[%c0_77, %c0_78], %174 {strides = array<i32>} : memref<8x128xf32, #tpu.memory_space<vmem>>, vector<8x128xf32>,
    return
  }
  func.func @transform_0(%arg0: i32) -> (i32, i32) {
    %c0_i32 = arith.constant 0 : i32
    %c0_i32_0 = arith.constant 0 : i32
    return %arg0, %c0_i32 : i32, i32
  }
  func.func @transform_1(%arg0: i32) -> (i32, i32) {
    %c0_i32 = arith.constant 0 : i32
    %c0_i32_0 = arith.constant 0 : i32
    return %arg0, %c0_i32 : i32, i32
  }
  func.func @transform_2(%arg0: i32) -> (i32, i32, i32) {
    %c0_i32 = arith.constant 0 : i32
    %c0_i32_0 = arith.constant 0 : i32
    %c0_i32_1 = arith.constant 0 : i32
    %c0_i32_2 = arith.constant 0 : i32
    return %c0_i32, %c0_i32_0, %c0_i32_1 : i32, i32, i32
  }
  func.func @transform_3(%arg0: i32) -> (i32, i32) {
    %c0_i32 = arith.constant 0 : i32
    %c0_i32_0 = arith.constant 0 : i32
    %c0_i32_1 = arith.constant 0 : i32
    return %c0_i32, %c0_i32_0 : i32, i32
  }
  func.func @transform_4(%arg0: i32) -> (i32, i32) {
    %c0_i32 = arith.constant 0 : i32
    %c0_i32_0 = arith.constant 0 : i32
    return %arg0, %c0_i32 : i32, i32
  }
}

</mosaic_0001>

<bundles_post_ra>
// kernel: pose_vae_forward_packed.1
= control target key start
LH: loop header
LB: loop body
LE: loop exit
PB: predicated region body
PF: predicated region fallthrough
CT: control target
= control target key end

     0   :  { %9 = vsyncpa [#allocation3], 0  ;;  %s1556_s0 = inlined_call_operand.hbm [shape: f32[8,24], index: 0, kind: input, shape index: {}]   ;;  %s1557_s1 = inlined_call_operand.hbm [shape: f32[8,16], index: 1, kind: input, shape index: {}]   ;;  %s1558_s2 = inlined_call_operand.hbm [shape: f32[6,128,128], index: 2, kind: input, shape index: {}]   ;;  %s1559_s3 = inlined_call_operand.hbm [shape: f32[16,128], index: 3, kind: input, shape index: {}]   ;;  %s1560_s4 = inlined_call_operand.hbm [shape: f32[8,128], index: 4, kind: output, shape index: {}]  }
   0x1   :  { %10 = vsyncpa [#allocation6], 0 }
   0x2   :  { %11 = vsyncpa [#allocation9], 0 }
   0x3   :  { %12 = vsyncpa [#allocation4], 0  ;;  %s1393_s15 = smov [#allocation5]   ;;  %s1394_s17 = smov [#allocation2]  }
   0x4   :  { %s29_s16 = sshll.u32 %s1393_s15, 4  ;;  %s19_s18 = sshll.u32 %s1394_s17, 4  ;;  %s30_s16 = int_to_ptr.vmem [resolvable:$true] %s29_s16  ;;  %s20_s18 = int_to_ptr.vmem [resolvable:$true] %s19_s18 }
   0x5   :  { %s1275_s21 = scalar_lea.hbm %s1557_s1, 128 }
   0x6   :  { %p1276_p0 = scmp.ne.s32.totalorder %s1557_s1, %s1275_s21  ;;  %p1279_p1 = scmp.lt.u32.totalorder %s1275_s21, %s1557_s1 }
   0x8   :  { %p1281_p2 = pnand %p1279_p1, %p1276_p0 }
   0xa   :  { %1284 = shalt.err (!%p1281_p2)
}
   0xb   :  { %s1285_s26 = scalar_lea.vmem %s30_s16, 128  ;;  %p1290_p4 = scmp.lt.s32.totalorder %s30_s16, %s30_s16 }
   0xc   :  { %p1286_p3 = scmp.ne.s32.totalorder %s30_s16, %s1285_s26  ;;  %p1291_p5 = scmp.lt.s32.totalorder %s1285_s26, %s1285_s26 }
   0xe   :  { %p1292_p6 = por %p1291_p5, %p1290_p4 }
  0x10   :  { %p1293_p7 = pnand %p1292_p6, %p1286_p3 }
  0x12   :  { %1296 = shalt.err (!%p1293_p7)
}
  0x13   :  { %32 = dma.hbm_to_vmem [thread:$0]  %s1557_s1, 128, %s30_s16, [#allocation6]  }
  0x14   :  { %s1297_s5 = scalar_lea.hbm %s1556_s0, 128 }
  0x15   :  { %p1298_p8 = scmp.ne.s32.totalorder %s1556_s0, %s1297_s5  ;;  %p1301_p9 = scmp.lt.u32.totalorder %s1297_s5, %s1556_s0 }
  0x17   :  { %p1303_p10 = pnand %p1301_p9, %p1298_p8 }
  0x19   :  { %1306 = shalt.err (!%p1303_p10)
}
  0x1a   :  { %s1307_s10 = scalar_lea.vmem %s20_s18, 128  ;;  %p1312_p12 = scmp.lt.s32.totalorder %s20_s18, %s20_s18 }
  0x1b   :  { %p1308_p11 = scmp.ne.s32.totalorder %s20_s18, %s1307_s10  ;;  %p1313_p13 = scmp.lt.s32.totalorder %s1307_s10, %s1307_s10 }
  0x1d   :  { %p1314_p0 = por %p1313_p13, %p1312_p12 }
  0x1f   :  { %p1315_p1 = pnand %p1314_p0, %p1308_p11 }
  0x21   :  { %1318 = shalt.err (!%p1315_p1)
}
  0x22   :  { %22 = dma.hbm_to_vmem [thread:$0]  %s1556_s0, 128, %s20_s18, [#allocation3]  }
  0x23   :  { %s1395_s12 = smov [#allocation7]   ;;  %s1319_s16 = scalar_lea.hbm %s1558_s2, 12288 }
  0x24   :  { %s38_s13 = sshll.u32 %s1395_s12, 4  ;;  %p1320_p2 = scmp.ne.s32.totalorder %s1558_s2, %s1319_s16  ;;  %s39_s13 = int_to_ptr.vmem [resolvable:$true] %s38_s13 }
  0x25   :  { %p1323_p3 = scmp.lt.u32.totalorder %s1319_s16, %s1558_s2 }
  0x27   :  { %p1325_p4 = pnand %p1323_p3, %p1320_p2 }
  0x29   :  { %1328 = shalt.err (!%p1325_p4)
}
  0x2a   :  { %s1329_s22 = scalar_lea.vmem %s39_s13, 12288  ;;  %p1334_p6 = scmp.lt.s32.totalorder %s39_s13, %s39_s13 }
  0x2b   :  { %p1330_p5 = scmp.ne.s32.totalorder %s39_s13, %s1329_s22  ;;  %p1335_p7 = scmp.lt.s32.totalorder %s1329_s22, %s1329_s22 }
  0x2d   :  { %p1336_p8 = por %p1335_p7, %p1334_p6 }
  0x2f   :  { %p1337_p9 = pnand %p1336_p8, %p1330_p5 }
  0x31   :  { %1340 = shalt.err (!%p1337_p9)
}
  0x32   :  { %s1396_s0 = smov 128   ;;  %s1397_s18 = smov 8  }
  0x33   :  { %44 = dma.hbm_to_vmem [thread:$0]  %s1558_s2, 12288, %s39_s13, [#allocation6], %s1396_s0, %s1396_s0, %s1397_s18  }
  0x34   :  { %s1398_s25 = smov [#allocation8]   ;;  %s1341_s29 = scalar_lea.hbm %s1559_s3, 256 }
  0x35   :  { %s50_s26 = sshll.u32 %s1398_s25, 4  ;;  %p1342_p10 = scmp.ne.s32.totalorder %s1559_s3, %s1341_s29  ;;  %s51_s26 = int_to_ptr.vmem [resolvable:$true] %s50_s26 }
  0x36   :  { %p1345_p11 = scmp.lt.u32.totalorder %s1341_s29, %s1559_s3 }
  0x38   :  { %p1347_p12 = pnand %p1345_p11, %p1342_p10 }
  0x3a   :  { %1350 = shalt.err (!%p1347_p12)
}
  0x3b   :  { %s1351_s8 = scalar_lea.vmem %s51_s26, 256  ;;  %p1356_p0 = scmp.lt.s32.totalorder %s51_s26, %s51_s26 }
  0x3c   :  { %p1352_p13 = scmp.ne.s32.totalorder %s51_s26, %s1351_s8  ;;  %p1357_p1 = scmp.lt.s32.totalorder %s1351_s8, %s1351_s8 }
  0x3e   :  { %p1358_p2 = por %p1357_p1, %p1356_p0 }
  0x40   :  { %p1359_p3 = pnand %p1358_p2, %p1352_p13 }
  0x42   :  { %1362 = shalt.err (!%p1359_p3)
}
  0x43   :  { %56 = dma.hbm_to_vmem [thread:$0]  %s1559_s3, 256, %s51_s26, [#allocation9], %s1396_s0, %s1396_s0, %s1397_s18  }
  0x44   :  { %1385 = dma.done.wait [#allocation3], 128  }
  0x45   :  { %1386 = vsyncadd [#allocation3], 4294967168 }
  0x46   :  { %1387 = dma.done.wait [#allocation6], 12416  }
  0x47   :  { %1388 = vsyncadd [#allocation6], 4294954880 }
  0x48   :  { %1389 = dma.done.wait [#allocation9], 256  }
  0x49   :  { %1390 = vsyncadd [#allocation9], 4294967040  ;;  %v1399_v0 = vmov 0.0|0.0   ;;  %vm1400_vm0 = vmmov 0   ;;  %v1401_v1 = vmov 0.0   ;;  %v71_v2 = vld [vmem:[#allocation7] sm:$0xff] }
  0x4a   :  { %1129 = vmatprep.subr.bf16.mxu0 %v1399_v0  ;;  %944 = vmatprep.mubr.msk.f32.mxu0 %vm1400_vm0, %v1401_v1  ;;  %v72_v3 = vld [vmem:[#allocation7 + $0x8] sm:$0xff]  ;;  %v73_v5 = vld [vmem:[#allocation7 + $0x10] sm:$0xff]  ;;  %vm79_vm1 = vcmask 195584   ;;  %v830_v7 = vld [vmem:[#allocation8] ss:$0 sm:$0xff]  ;;  %vm416_vm4 = vcmask 130048  }
  0x4b   :  { %1132 = vmatprep.subr.bf16.mxu1 %v1399_v0  ;;  %979 = vmatprep.mubr.msk.f32.mxu1 %vm1400_vm0, %v1401_v1  ;;  %v1130_v4 = vpack.c.bf16 %v72_v3, %v71_v2  ;;  %v69_v6 = vld [vmem:[#allocation2] sm:$0xff]  ;;  %v183_v12 = vld [vmem:[#allocation7 + $0x80] sm:$0xff]  ;;  %v184_v13 = vld [vmem:[#allocation7 + $0x88] sm:$0xff]  ;;  %s1402_s3 = smov [#allocation10]  }
  0x4c   :  { %v1133_v14 = vpack.c.bf16 %v184_v13, %v183_v12  ;;  %v185_v15 = vld [vmem:[#allocation7 + $0x90] sm:$0xff]  ;;  %v186_v16 = vld [vmem:[#allocation7 + $0x98] sm:$0xff]  ;;  %v187_v18 = vld [vmem:[#allocation7 + $0xa0] sm:$0xff]  ;;  %s819_s10 = sshll.u32 %s1402_s3, 4  ;;  %s820_s10 = int_to_ptr.vmem [resolvable:$true] %s819_s10 }
  0x4d   :  { %1131 = vmatpush3.bf16.msra.mxu0 %v1130_v4  ;;  %v1136_v17 = vpack.c.bf16 %v186_v16, %v185_v15  ;;  %v188_v19 = vld [vmem:[#allocation7 + $0xa8] sm:$0xff]  ;;  %v189_v21 = vld [vmem:[#allocation7 + $0xb0] sm:$0xff]  ;;  %v190_v22 = vld [vmem:[#allocation7 + $0xb8] sm:$0xff]  ;;  %s1363_s1 = scalar_lea.vmem %s820_s10, 128  ;;  %p1368_p5 = scmp.lt.s32.totalorder %s820_s10, %s820_s10 }
  0x4e   :  { %942 = vmatprep.subr.mxu0 %v1401_v1  ;;  %1134 = vmatpush3.bf16.msra.mxu1 %v1133_v14  ;;  %v1139_v20 = vpack.c.bf16 %v188_v19, %v187_v18  ;;  %v1142_v23 = vpack.c.bf16 %v190_v22, %v189_v21  ;;  %v191_v24 = vld [vmem:[#allocation7 + $0xc0] sm:$0xff]  ;;  %v192_v25 = vld [vmem:[#allocation7 + $0xc8] sm:$0xff]  ;;  %v193_v27 = vld [vmem:[#allocation7 + $0xd0] sm:$0xff]  ;;  %p1364_p4 = scmp.ne.s32.totalorder %s820_s10, %s1363_s1  ;;  %p1369_p6 = scmp.lt.s32.totalorder %s1363_s1, %s1363_s1 }
  0x4f   :  { %1135 = vmatprep.subr.bf16.mxu1 %v1399_v0  ;;  %v1145_v26 = vpack.c.bf16 %v192_v25, %v191_v24  ;;  %v194_v28 = vld [vmem:[#allocation7 + $0xd8] sm:$0xff]  ;;  %v195_v30 = vld [vmem:[#allocation7 + $0xe0] sm:$0xff]  ;;  %v196_v31 = vld [vmem:[#allocation7 + $0xe8] sm:$0xff] }
  0x50   :  { %v1148_v29 = vpack.c.bf16 %v194_v28, %v193_v27  ;;  %v1151_v32 = vpack.c.bf16 %v196_v31, %v195_v30  ;;  %v197_v33 = vld [vmem:[#allocation7 + $0xf0] sm:$0xff]  ;;  %v198_v34 = vld [vmem:[#allocation7 + $0xf8] sm:$0xff]  ;;  %v832_v46 = vld [vmem:[#allocation8 + $0x1] ss:$0 sm:$0xff]  ;;  %p1370_p7 = por %p1369_p6, %p1368_p5 }
  0x51   :  { %943 = vmatpush3.msra.mxu0 %v73_v5  ;;  %v1154_v35 = vpack.c.bf16 %v198_v34, %v197_v33  ;;  %v833_v48 = vld [vmem:[#allocation8 + $0x2] ss:$0 sm:$0xff]  ;;  %v834_v53 = vld [vmem:[#allocation8 + $0x3] ss:$0 sm:$0xff]  ;;  %v305_v59 = vld [vmem:[#allocation7 + $0x108] sm:$0xff] }
  0x52   :  { %945 = vmatmul.mubr.msk.f32.vlgmr.msra.gmra.mrb[0].mxu0 %vm79_vm1, %v69_v6  ;;  %1156 = vmatprep.subr.bf16.mxu0 %v1399_v0  ;;  %v304_v58 = vld [vmem:[#allocation7 + $0x100] sm:$0xff]  ;;  %v306_v61 = vld [vmem:[#allocation7 + $0x110] sm:$0xff]  ;;  %v307_v62 = vld [vmem:[#allocation7 + $0x118] sm:$0xff]  ;;  %p1371_p8 = pnand %p1370_p7, %p1364_p4 }
  0x53   :  { %1014 = vmatprep.mubr.msk.f32.mxu0 %vm1400_vm0, %v1401_v1  ;;  %1137 = vmatpush3.bf16.msra.mxu1 %v1136_v17  ;;  %v1157_v60 = vpack.c.bf16 %v305_v59, %v304_v58  ;;  %v1160_v63 = vpack.c.bf16 %v307_v62, %v306_v61  ;;  %v308_v2 = vld [vmem:[#allocation7 + $0x120] sm:$0xff]  ;;  %v309_v3 = vld [vmem:[#allocation7 + $0x128] sm:$0xff]  ;;  %v310_v5 = vld [vmem:[#allocation7 + $0x130] sm:$0xff] }
  0x54   :  { %1138 = vmatprep.subr.bf16.mxu1 %v1399_v0  ;;  %v1163_v4 = vpack.c.bf16 %v309_v3, %v308_v2  ;;  %v311_v6 = vld [vmem:[#allocation7 + $0x138] sm:$0xff]  ;;  %v316_v14 = vld [vmem:[#allocation7 + $0x160] sm:$0xff]  ;;  %v317_v15 = vld [vmem:[#allocation7 + $0x168] sm:$0xff] }
  0x55   :  { %1158 = vmatpush3.bf16.msra.mxu0 %v1157_v60  ;;  %v315_v12 = vld [vmem:[#allocation7 + $0x158] sm:$0xff]  ;;  %v1175_v16 = vpack.c.bf16 %v317_v15, %v316_v14  ;;  %v318_v17 = vld [vmem:[#allocation7 + $0x170] sm:$0xff]  ;;  %v401_v21 = vld [vmem:[#allocation7 + $0x188] sm:$0xff] }
  0x56   :  { %1159 = vmatprep.subr.bf16.mxu0 %v1399_v0  ;;  %v319_v18 = vld [vmem:[#allocation7 + $0x178] sm:$0xff]  ;;  %v402_v22 = vld [vmem:[#allocation7 + $0x190] sm:$0xff]  ;;  %v405_v27 = vld [vmem:[#allocation7 + $0x1a8] sm:$0xff] }
  0x57   :  { %1140 = vmatpush3.bf16.msra.mxu1 %v1139_v20  ;;  %v1178_v19 = vpack.c.bf16 %v319_v18, %v318_v17  ;;  %v400_v20 = vld [vmem:[#allocation7 + $0x180] sm:$0xff]  ;;  %v403_v24 = vld [vmem:[#allocation7 + $0x198] sm:$0xff]  ;;  %v409_v33 = vld [vmem:[#allocation7 + $0x1c8] sm:$0xff] }
  0x58   :  { %1141 = vmatprep.subr.bf16.mxu1 %v1399_v0  ;;  %v1187_v25 = vpack.c.bf16 %v403_v24, %v402_v22  ;;  %v407_v30 = vld [vmem:[#allocation7 + $0x1b8] sm:$0xff]  ;;  %v414_v59 = vld [vmem:[#allocation7 + $0x1f0] sm:$0xff]  ;;  %v839_v14 = vld [vmem:[#allocation8 + $0x7] ss:$0 sm:$0xff] }
  0x59   :  { %1161 = vmatpush3.bf16.msra.mxu0 %v1160_v63  ;;  %v415_v60 = vld [vmem:[#allocation7 + $0x1f8] sm:$0xff]  ;;  %v601_v22 = vld [vmem:[#allocation7 + $0x228] sm:$0xff]  ;;  %v602_v24 = vld [vmem:[#allocation7 + $0x230] sm:$0xff] }
  0x5a   :  { %1162 = vmatprep.subr.bf16.mxu0 %v1399_v0  ;;  %v1205_v61 = vpack.c.bf16 %v415_v60, %v414_v59  ;;  %v842_v60 = vld [vmem:[#allocation8 + $0xa] ss:$0 sm:$0xff] }
  0x5b   :  { %1143 = vmatpush3.bf16.msra.mxu1 %v1142_v23  ;;  %v1184_v23 = vpack.c.bf16 %v401_v21, %v400_v20  ;;  %v599_v20 = vld [vmem:[#allocation7 + $0x218] sm:$0xff] }
  0x5c   :  { %1144 = vmatprep.subr.bf16.mxu1 %v1399_v0 }
  0x5d   :  { %1164 = vmatpush3.bf16.msra.mxu0 %v1163_v4 }
  0x5e   :  { %1165 = vmatprep.subr.bf16.mxu0 %v1399_v0 }
  0x5f   :  { %1146 = vmatpush3.bf16.msra.mxu1 %v1145_v26  ;;  %v404_v26 = vld [vmem:[#allocation7 + $0x1a0] sm:$0xff] }
  0x60   :  { %1147 = vmatprep.subr.bf16.mxu1 %v1399_v0  ;;  %v1190_v28 = vpack.c.bf16 %v405_v27, %v404_v26  ;;  %v604_v27 = vld [vmem:[#allocation7 + $0x240] sm:$0xff] }
  0x63   :  { %1149 = vmatpush3.bf16.msra.mxu1 %v1148_v29  ;;  %v406_v29 = vld [vmem:[#allocation7 + $0x1b0] sm:$0xff] }
  0x64   :  { %1150 = vmatprep.subr.bf16.mxu1 %v1399_v0  ;;  %v1193_v31 = vpack.c.bf16 %v407_v30, %v406_v29  ;;  %v606_v30 = vld [vmem:[#allocation7 + $0x250] sm:$0xff] }
  0x67   :  { %1152 = vmatpush3.bf16.msra.mxu1 %v1151_v32  ;;  %v408_v32 = vld [vmem:[#allocation7 + $0x1c0] sm:$0xff] }
  0x68   :  { %1153 = vmatprep.subr.bf16.mxu1 %v1399_v0  ;;  %v1181_v34 = vpack.c.bf16 %v409_v33, %v408_v32  ;;  %v608_v33 = vld [vmem:[#allocation7 + $0x260] sm:$0xff] }
  0x6b   :  { %1155 = vmatpush3.bf16.msra.mxu1 %v1154_v35  ;;  %v410_v35 = vld [vmem:[#allocation7 + $0x1d0] sm:$0xff] }
  0x6c   :  { %1183 = vmatprep.subr.bf16.mxu1 %v1399_v0 }
 0x125   :  { %v149_v8 = vpop.f32.mrb[0].mxu0 }
 0x126   :  { %v150_v9 = vadd.f32 %v830_v7, %v149_v8  ;;  %v946_v10 = vpop.f32.mrb[1].mxu0  ;;  %v1166_v7 = vpack.c.bf16 %v311_v6, %v310_v5  ;;  %v312_v8 = vld [vmem:[#allocation7 + $0x140] sm:$0xff]  ;;  %v70_v5 = vld [vmem:[#allocation5] sm:$0xff] }
 0x128   :  { %153 = vadd.xlane.f32.xlu0 %v150_v9  ;;  %v156_v11 = vmul.f32 %v150_v9, %v150_v9  ;;  %1167 = vmatpush3.bf16.msra.mxu0 %v1166_v7 }
 0x129   :  { %1168 = vmatprep.subr.bf16.mxu0 %v1399_v0 }
 0x12c   :  { %157 = vadd.xlane.f32.xlu0 %v156_v11  ;;  %v314_v11 = vld [vmem:[#allocation7 + $0x150] sm:$0xff] }
 0x12d   :  { %v1172_v13 = vpack.c.bf16 %v315_v12, %v314_v11 }
 0x1b5   :  { %v154_v36 = vpop.xlane.xlu0 %153 }
 0x1b6   :  { %v155_v37 = vmul.f32 0.015625, %v154_v36  ;;  %v411_v36 = vld [vmem:[#allocation7 + $0x1d8] sm:$0xff] }
 0x1b8   :  { %v160_v39 = vmul.f32 %v155_v37, %v155_v37  ;;  %v163_v44 = vsub.f32 %v150_v9, %v155_v37  ;;  %v313_v9 = vld [vmem:[#allocation7 + $0x148] sm:$0xff]  ;;  %v1199_v37 = vpack.c.bf16 %v411_v36, %v410_v35  ;;  %v610_v36 = vld [vmem:[#allocation7 + $0x270] sm:$0xff] }
 0x1b9   :  { %v158_v38 = vpop.xlane.xlu0 %157  ;;  %v1169_v10 = vpack.c.bf16 %v313_v9, %v312_v8  ;;  %v596_v8 = vld [vmem:[#allocation7 + $0x200] sm:$0xff]  ;;  %v597_v9 = vld [vmem:[#allocation7 + $0x208] sm:$0xff] }
 0x1ba   :  { %v159_v40 = vmul.f32 0.015625, %v158_v38  ;;  %v412_v38 = vld [vmem:[#allocation7 + $0x1e0] sm:$0xff] }
 0x1bb   :  { %1170 = vmatpush3.bf16.msra.mxu0 %v1169_v10  ;;  %v1208_v10 = vpack.c.bf16 %v597_v9, %v596_v8  ;;  %v723_v9 = vld [vmem:[#allocation7 + $0x2b0] sm:$0xff] }
 0x1bc   :  { %v161_v41 = vsub.f32 %v159_v40, %v160_v39  ;;  %1171 = vmatprep.subr.bf16.mxu0 %v1399_v0  ;;  %v413_v39 = vld [vmem:[#allocation7 + $0x1e8] sm:$0xff] }
 0x1bd   :  { %v1202_v40 = vpack.c.bf16 %v413_v39, %v412_v38 }
 0x1be   :  { %v162_v42 = vmax.f32 %v161_v41, 0.0 }
 0x1bf   :  { %1173 = vmatpush3.bf16.msra.mxu0 %v1172_v13 }
 0x1c0   :  { %v164_v43 = vadd.f32 1e-05, %v162_v42  ;;  %1174 = vmatprep.subr.bf16.mxu0 %v1399_v0 }
 0x1c2   :  { %1265 = vrsqrt.f32 %v164_v43 }
 0x1c3   :  { %1176 = vmatpush3.bf16.msra.mxu0 %v1175_v16 }
 0x1c4   :  { %1177 = vmatprep.subr.bf16.mxu0 %v1399_v0 }
 0x1c7   :  { %1179 = vmatpush3.bf16.msra.mxu0 %v1178_v19  ;;  %v598_v19 = vld [vmem:[#allocation7 + $0x210] sm:$0xff] }
 0x1c8   :  { %1180 = vmatprep.subr.bf16.mxu0 %v1399_v0  ;;  %v1211_v21 = vpack.c.bf16 %v599_v20, %v598_v19  ;;  %v730_v19 = vld [vmem:[#allocation7 + $0x2e8] sm:$0xff] }
 0x1cc   :  { %v1266_v45 = vpop.eup %1265 }
 0x1cd   :  { %v166_v47 = vmul.f32 %v1266_v45, %v163_v44 }
 0x1cf   :  { %v172_v49 = vmul.f32 %v832_v46, %v166_v47 }
 0x1d1   :  { %v178_v50 = vadd.f32 %v833_v48, %v172_v49 }
 0x1d3   :  { %vm179_vm2 = vcmp.gt.f32.partialorder %v178_v50, 0.0  ;;  %v180_v51 = vmul.f32 0.2, %v178_v50 }
 0x1d5   :  { %v181_v52 = vsel %vm179_vm2, %v178_v50, %v180_v51  ;;  %v835_v51 = vld [vmem:[#allocation8 + $0x4] ss:$0 sm:$0xff] }
 0x1d6   :  { %980 = vmatmul.mubr.f32.vlgmr.msra.gmra.mrb[0].mxu1 %v181_v52 }
 0x1d7   :  { %1056 = vmatprep.mubr.msk.f32.mxu1 %vm1400_vm0, %v1401_v1  ;;  %1185 = vmatpush3.bf16.msra.mxu1 %v1184_v23 }
 0x1d8   :  { %1186 = vmatprep.subr.bf16.mxu1 %v1399_v0 }
 0x1db   :  { %1188 = vmatpush3.bf16.msra.mxu1 %v1187_v25  ;;  %v603_v25 = vld [vmem:[#allocation7 + $0x238] sm:$0xff] }
 0x1dc   :  { %1189 = vmatprep.subr.bf16.mxu1 %v1399_v0  ;;  %v1217_v26 = vpack.c.bf16 %v603_v25, %v602_v24 }
 0x1df   :  { %1191 = vmatpush3.bf16.msra.mxu1 %v1190_v28  ;;  %v605_v28 = vld [vmem:[#allocation7 + $0x248] sm:$0xff] }
 0x1e0   :  { %1192 = vmatprep.subr.bf16.mxu1 %v1399_v0  ;;  %v1220_v29 = vpack.c.bf16 %v605_v28, %v604_v27 }
 0x1e3   :  { %1194 = vmatpush3.bf16.msra.mxu1 %v1193_v31  ;;  %v607_v31 = vld [vmem:[#allocation7 + $0x258] sm:$0xff] }
 0x1e4   :  { %1195 = vmatprep.subr.bf16.mxu1 %v1399_v0  ;;  %v1223_v32 = vpack.c.bf16 %v607_v31, %v606_v30 }
 0x1e7   :  { %1197 = vmatpush3.bf16.msra.mxu1 %v1181_v34 }
 0x1e8   :  { %1198 = vmatprep.subr.bf16.mxu1 %v1399_v0 }
 0x1eb   :  { %1200 = vmatpush3.bf16.msra.mxu1 %v1199_v37  ;;  %v611_v37 = vld [vmem:[#allocation7 + $0x278] sm:$0xff] }
 0x1ec   :  { %1201 = vmatprep.subr.bf16.mxu1 %v1399_v0  ;;  %v1229_v38 = vpack.c.bf16 %v611_v37, %v610_v36 }
 0x1ef   :  { %1203 = vmatpush3.bf16.msra.mxu1 %v1202_v40 }
 0x1f0   :  { %1204 = vmatprep.subr.bf16.mxu1 %v1399_v0 }
 0x1f3   :  { %1206 = vmatpush3.bf16.msra.mxu1 %v1205_v61 }
 0x1f4   :  { %1231 = vmatprep.subr.bf16.mxu1 %v1399_v0 }
 0x2a9   :  { %v270_v54 = vpop.f32.mrb[0].mxu1 }
 0x2aa   :  { %v1496_v55 = vadd.f32 %v834_v53, %v270_v54  ;;  %v981_v56 = vpop.f32.mrb[1].mxu1  ;;  %v836_v53 = vld [vmem:[#allocation8 + $0x5] ss:$0 sm:$0xff] }
 0x2ac   :  { %274 = vadd.xlane.f32.xlu1 %v1496_v55  ;;  %v277_v57 = vmul.f32 %v1496_v55, %v1496_v55 }
 0x2b0   :  { %278 = vadd.xlane.f32.xlu1 %v277_v57 }
 0x339   :  { %v275_v41 = vpop.xlane.xlu1 %274 }
 0x33a   :  { %v276_v42 = vmul.f32 0.015625, %v275_v41 }
 0x33c   :  { %v281_v44 = vmul.f32 %v276_v42, %v276_v42  ;;  %v284_v49 = vsub.f32 %v1496_v55, %v276_v42  ;;  %v837_v55 = vld [vmem:[#allocation8 + $0x6] ss:$0 sm:$0xff] }
 0x33d   :  { %v279_v43 = vpop.xlane.xlu1 %278 }
 0x33e   :  { %v280_v45 = vmul.f32 0.015625, %v279_v43 }
 0x340   :  { %v282_v46 = vsub.f32 %v280_v45, %v281_v44 }
 0x342   :  { %v283_v47 = vmax.f32 %v282_v46, 0.0 }
 0x344   :  { %v285_v48 = vadd.f32 1e-05, %v283_v47 }
 0x346   :  { %1267 = vrsqrt.f32 %v285_v48 }
 0x350   :  { %v1268_v50 = vpop.eup %1267 }
 0x351   :  { %v287_v52 = vmul.f32 %v1268_v50, %v284_v49  ;;  %v840_v49 = vld [vmem:[#allocation8 + $0x8] ss:$0 sm:$0xff] }
 0x353   :  { %v293_v54 = vmul.f32 %v835_v51, %v287_v52  ;;  %v841_v51 = vld [vmem:[#allocation8 + $0x9] ss:$0 sm:$0xff] }
 0x355   :  { %v299_v56 = vadd.f32 %v836_v53, %v293_v54 }
 0x357   :  { %vm300_vm3 = vcmp.gt.f32.partialorder %v299_v56, 0.0  ;;  %v301_v57 = vmul.f32 0.2, %v299_v56 }
 0x359   :  { %v302_v58 = vsel %vm300_vm3, %v299_v56, %v301_v57  ;;  %v717_v57 = vld [vmem:[#allocation7 + $0x280] sm:$0xff] }
 0x35a   :  { %1015 = vmatmul.mubr.f32.vlgmr.msra.gmra.mrb[2].mxu0 %v302_v58  ;;  %v718_v58 = vld [vmem:[#allocation7 + $0x288] sm:$0xff] }
 0x35b   :  { %1182 = vmatpush3.bf16.msra.mxu0 %v1181_v34  ;;  %1021 = vmatprep.mubr.msk.f32.mxu0 %vm1400_vm0, %v1401_v1  ;;  %v609_v34 = vld [vmem:[#allocation7 + $0x268] sm:$0xff]  ;;  %v1232_v59 = vpack.c.bf16 %v718_v58, %v717_v57 }
 0x35c   :  { %1207 = vmatprep.subr.bf16.mxu0 %v1399_v0  ;;  %v1226_v35 = vpack.c.bf16 %v609_v34, %v608_v33  ;;  %v843_v33 = vld [vmem:[#allocation8 + $0xb] ss:$0 sm:$0xff] }
 0x42d   :  { %v391_v62 = vpop.f32.mrb[2].mxu0 }
 0x42e   :  { %v1521_v63 = vadd.f32 %v837_v55, %v391_v62  ;;  %v1016_v2 = vpop.f32.mrb[3].mxu0 }
 0x430   :  { %v395_v3 = vmul.f32 0.5, %v1521_v63  ;;  %1057 = vmatmul.mubr.f32.vlgmr.msra.gmra.mrb[2].mxu1 %v1521_v63 }
 0x431   :  { %1126 = vmatprep.mubr.msk.f32.mxu1 %vm1400_vm0, %v1401_v1  ;;  %1233 = vmatpush3.bf16.msra.mxu1 %v1232_v59 }
 0x432   :  { %v396_v4 = vmul.f32 1.442695, %v395_v3  ;;  %1234 = vmatprep.subr.bf16.mxu1 %v1399_v0  ;;  %v719_v3 = vld [vmem:[#allocation7 + $0x290] sm:$0xff] }
 0x434   :  { %1269 = vpow2.f32 %v396_v4  ;;  %v720_v4 = vld [vmem:[#allocation7 + $0x298] sm:$0xff] }
 0x43e   :  { %v1270_v6 = vpop.eup %1269 }
 0x43f   :  { %v398_v7 = vmul.f32 %v1270_v6, %v70_v5  ;;  %v1235_v5 = vpack.c.bf16 %v720_v4, %v719_v3  ;;  %v721_v6 = vld [vmem:[#allocation7 + $0x2a0] sm:$0xff] }
 0x441   :  { %1022 = vmatmul.mubr.msk.f32.vlgmr.msra.gmra.mrb[4].mxu0 %vm416_vm4, %v398_v7  ;;  %1236 = vmatpush3.bf16.msra.mxu1 %v1235_v5  ;;  %v722_v7 = vld [vmem:[#allocation7 + $0x2a8] sm:$0xff] }
 0x442   :  { %1091 = vmatprep.mubr.msk.f32.mxu0 %vm1400_vm0, %v1401_v1  ;;  %1209 = vmatpush3.bf16.msra.mxu0 %v1208_v10  ;;  %v600_v1 = vld [vmem:[#allocation7 + $0x220] sm:$0xff]  ;;  %v1238_v8 = vpack.c.bf16 %v722_v7, %v721_v6  ;;  %v724_v10 = vld [vmem:[#allocation7 + $0x2b8] sm:$0xff] }
 0x443   :  { %1210 = vmatprep.subr.bf16.mxu0 %v1399_v0  ;;  %v1214_v23 = vpack.c.bf16 %v601_v22, %v600_v1  ;;  %1237 = vmatprep.subr.bf16.mxu1 %v1399_v0  ;;  %v732_v1 = vld [vmem:[#allocation7 + $0x2f8] sm:$0xff] }
 0x445   :  { %1239 = vmatpush3.bf16.msra.mxu1 %v1238_v8 }
 0x446   :  { %1212 = vmatpush3.bf16.msra.mxu0 %v1211_v21  ;;  %1240 = vmatprep.subr.bf16.mxu1 %v1399_v0  ;;  %v731_v21 = vld [vmem:[#allocation7 + $0x2f0] sm:$0xff] }
 0x447   :  { %1213 = vmatprep.subr.bf16.mxu0 %v1399_v0  ;;  %v1253_v22 = vpack.c.bf16 %v732_v1, %v731_v21 }
 0x44a   :  { %1215 = vmatpush3.bf16.msra.mxu0 %v1214_v23 }
 0x44b   :  { %1216 = vmatprep.subr.bf16.mxu0 %v1399_v0 }
 0x44e   :  { %1218 = vmatpush3.bf16.msra.mxu0 %v1217_v26 }
 0x44f   :  { %1219 = vmatprep.subr.bf16.mxu0 %v1399_v0 }
 0x452   :  { %1221 = vmatpush3.bf16.msra.mxu0 %v1220_v29 }
 0x453   :  { %1222 = vmatprep.subr.bf16.mxu0 %v1399_v0 }
 0x456   :  { %1224 = vmatpush3.bf16.msra.mxu0 %v1223_v32 }
 0x457   :  { %1225 = vmatprep.subr.bf16.mxu0 %v1399_v0 }
 0x45a   :  { %1227 = vmatpush3.bf16.msra.mxu0 %v1226_v35  ;;  %v844_v35 = vld [vmem:[#allocation8 + $0xc] ss:$0 sm:$0xff] }
 0x45b   :  { %1228 = vmatprep.subr.bf16.mxu0 %v1399_v0 }
 0x45e   :  { %1230 = vmatpush3.bf16.msra.mxu0 %v1229_v38 }
 0x503   :  { %v556_v11 = vpop.f32.mrb[2].mxu1 }
 0x504   :  { %v1058_v12 = vpop.f32.mrb[3].mxu1 }
 0x505   :  { %v725_v12 = vld [vmem:[#allocation7 + $0x2c0] sm:$0xff] }
 0x514   :  { %v486_v13 = vpop.f32.mrb[4].mxu0 }
 0x515   :  { %v557_v15 = vadd.f32 %v556_v11, %v486_v13  ;;  %v1023_v16 = vpop.f32.mrb[5].mxu0  ;;  %v1241_v11 = vpack.c.bf16 %v724_v10, %v723_v9  ;;  %v726_v13 = vld [vmem:[#allocation7 + $0x2c8] sm:$0xff] }
 0x516   :  { %v728_v16 = vld [vmem:[#allocation7 + $0x2d8] sm:$0xff] }
 0x517   :  { %v565_v17 = vadd.f32 %v839_v14, %v557_v15  ;;  %1242 = vmatpush3.bf16.msra.mxu1 %v1241_v11  ;;  %v1244_v14 = vpack.c.bf16 %v726_v13, %v725_v12  ;;  %v727_v15 = vld [vmem:[#allocation7 + $0x2d0] sm:$0xff] }
 0x518   :  { %1243 = vmatprep.subr.bf16.mxu1 %v1399_v0 }
 0x519   :  { %566 = vadd.xlane.f32.xlu0 %v565_v17  ;;  %v569_v18 = vmul.f32 %v565_v17, %v565_v17 }
 0x51b   :  { %570 = vadd.xlane.f32.xlu1 %v569_v18  ;;  %1245 = vmatpush3.bf16.msra.mxu1 %v1244_v14  ;;  %v729_v18 = vld [vmem:[#allocation7 + $0x2e0] sm:$0xff] }
 0x51c   :  { %1246 = vmatprep.subr.bf16.mxu1 %v1399_v0  ;;  %v1250_v20 = vpack.c.bf16 %v730_v19, %v729_v18 }
 0x5a6   :  { %v567_v39 = vpop.xlane.xlu0 %566 }
 0x5a7   :  { %v568_v40 = vmul.f32 0.015625, %v567_v39  ;;  %v808_v39 = vlaneseq }
 0x5a8   :  { %v571_v41 = vpop.xlane.xlu1 %570 }
 0x5a9   :  { %v573_v42 = vmul.f32 %v568_v40, %v568_v40  ;;  %v572_v43 = vmul.f32 0.015625, %v571_v41  ;;  %v576_v47 = vsub.f32 %v565_v17, %v568_v40  ;;  %v1247_v17 = vpack.c.bf16 %v728_v16, %v727_v15  ;;  %v845_v41 = vld [vmem:[#allocation8 + $0xd] ss:$0 sm:$0xff] }
 0x5aa   :  { %v809_v40 = vand.u32 127, %v808_v39 }
 0x5ab   :  { %v574_v44 = vsub.f32 %v572_v43, %v573_v42  ;;  %1248 = vmatpush3.bf16.msra.mxu1 %v1247_v17 }
 0x5ac   :  { %1249 = vmatprep.subr.bf16.mxu1 %v1399_v0  ;;  %vm810_vm7 = vcmp.lt.s32.totalorder %v809_v40, 64 }
 0x5ad   :  { %v575_v45 = vmax.f32 %v574_v44, 0.0 }
 0x5af   :  { %v577_v46 = vadd.f32 1e-05, %v575_v45  ;;  %1251 = vmatpush3.bf16.msra.mxu1 %v1250_v20 }
 0x5b0   :  { %1252 = vmatprep.subr.bf16.mxu1 %v1399_v0 }
 0x5b1   :  { %1271 = vrsqrt.f32 %v577_v46 }
 0x5b3   :  { %1254 = vmatpush3.bf16.msra.mxu1 %v1253_v22 }
 0x5bb   :  { %v1272_v48 = vpop.eup %1271 }
 0x5bc   :  { %v579_v50 = vmul.f32 %v1272_v48, %v576_v47 }
 0x5be   :  { %v585_v52 = vmul.f32 %v840_v49, %v579_v50 }
 0x5c0   :  { %v591_v53 = vadd.f32 %v841_v51, %v585_v52 }
 0x5c2   :  { %vm592_vm5 = vcmp.gt.f32.partialorder %v591_v53, 0.0  ;;  %v593_v54 = vmul.f32 0.2, %v591_v53 }
 0x5c4   :  { %v594_v56 = vsel %vm592_vm5, %v591_v53, %v593_v54 }
 0x5c5   :  { %1092 = vmatmul.mubr.f32.vlgmr.msra.gmra.mrb[6].mxu0 %v594_v56 }
 0x698   :  { %v683_v61 = vpop.f32.mrb[6].mxu0 }
 0x699   :  { %v684_v55 = vadd.f32 %v842_v60, %v683_v61  ;;  %v1093_v62 = vpop.f32.mrb[7].mxu0 }
 0x69b   :  { %687 = vadd.xlane.f32.xlu0 %v684_v55  ;;  %v690_v2 = vmul.f32 %v684_v55, %v684_v55 }
 0x69d   :  { %691 = vadd.xlane.f32.xlu1 %v690_v2 }
 0x728   :  { %v688_v23 = vpop.xlane.xlu0 %687 }
 0x729   :  { %v689_v24 = vmul.f32 0.015625, %v688_v23 }
 0x72a   :  { %v692_v25 = vpop.xlane.xlu1 %691 }
 0x72b   :  { %v694_v26 = vmul.f32 %v689_v24, %v689_v24  ;;  %v693_v27 = vmul.f32 0.015625, %v692_v25  ;;  %v697_v31 = vsub.f32 %v684_v55, %v689_v24 }
 0x72d   :  { %v695_v28 = vsub.f32 %v693_v27, %v694_v26 }
 0x72f   :  { %v696_v29 = vmax.f32 %v695_v28, 0.0 }
 0x731   :  { %v698_v30 = vadd.f32 1e-05, %v696_v29 }
 0x733   :  { %1273 = vrsqrt.f32 %v698_v30 }
 0x73d   :  { %v1274_v32 = vpop.eup %1273 }
 0x73e   :  { %v700_v34 = vmul.f32 %v1274_v32, %v697_v31 }
 0x740   :  { %v706_v36 = vmul.f32 %v843_v33, %v700_v34 }
 0x742   :  { %v712_v37 = vadd.f32 %v844_v35, %v706_v36 }
 0x744   :  { %vm713_vm6 = vcmp.gt.f32.partialorder %v712_v37, 0.0  ;;  %v714_v38 = vmul.f32 0.2, %v712_v37 }
 0x746   :  { %v715_v0 = vsel %vm713_vm6, %v712_v37, %v714_v38 }
 0x747   :  { %1127 = vmatmul.mubr.f32.vlgmr.msra.gmra.mrb[4].mxu1 %v715_v0 }
 0x81a   :  { %v804_v42 = vpop.f32.mrb[4].mxu1 }
 0x81b   :  { %v805_v43 = vadd.f32 %v845_v41, %v804_v42  ;;  %v1128_v44 = vpop.f32.mrb[5].mxu1 }
 0x81d   :  { %v811_v45 = vsel %vm810_vm7, %v805_v43, %v1521_v63 }
 0x81e   :  { %812 = vst [vmem:[#allocation10] sm:$0xff] %v811_v45 }
 0x81f   :  { %1374 = shalt.err (!%p1371_p8)
}
 0x820   :  { %s1375_s13 = scalar_lea.hbm %s1560_s4, 128 }
 0x821   :  { %p1376_p9 = scmp.ne.s32.totalorder %s1560_s4, %s1375_s13  ;;  %p1379_p10 = scmp.lt.u32.totalorder %s1375_s13, %s1560_s4 }
 0x823   :  { %p1381_p11 = pnand %p1379_p10, %p1376_p9 }
 0x825   :  { %1384 = shalt.err (!%p1381_p11)
}
 0x826   :  { %822 = dma.vmem_to_hbm [thread:$0]  %s820_s10, 128, %s1560_s4, [#allocation4]  }
 0x827   :  { %1391 = dma.done.wait [#allocation4], 128  }
 0x828   :  { %1392 = vsyncadd [#allocation4], 4294967168 }
 0x829   :  { %826 = vsyncpa [#allocation3], 1 }
 0x82a   :  { %827 = vsyncpa [#allocation6], 1 }
 0x82b   :  { %828 = vsyncpa [#allocation9], 1 }
 0x82c   :  { %829 = vsyncpa [#allocation4], 1 }

</bundles_post_ra>
